<compile_context>
chip_gen: v6e
topology: v6e:2x2x1
jax: 0.10.0
libtpu: 0.0.40
codegen_flags: <defaults>
</compile_context>

<pallas_src>
import functools

import jax
import jax.numpy as jnp
from jax.experimental import pallas as pl
from jax.experimental.pallas import tpu as pltpu

_EPS = 1e-6  # matches torch.nn.functional.pairwise_distance default eps


def _triplet_loss_kernel(a_ref, p_ref, n_ref, out_ref, *, margin, batch, tb):
    # Upcast to f32 in-kernel (keeps HBM traffic at the storage dtype).
    a = a_ref[...].astype(jnp.float32)
    p = p_ref[...].astype(jnp.float32)
    n = n_ref[...].astype(jnp.float32)

    # ||x1 - x2 + eps||_2 over the feature axis (keepdims -> (tb, 1) layout).
    pos_diff = a - p + _EPS
    neg_diff = a - n + _EPS
    pos_dist = jnp.sqrt(jnp.sum(pos_diff * pos_diff, axis=-1, keepdims=True))
    neg_dist = jnp.sqrt(jnp.sum(neg_diff * neg_diff, axis=-1, keepdims=True))

    hinge = jnp.maximum(pos_dist - neg_dist + margin, 0.0)  # (tb, 1)

    # Mask rows beyond the true batch on a ragged last tile (static check:
    # only emit the iota/where when there actually is a ragged tile).
    if batch % tb != 0:
        row = pl.program_id(0) * tb + jax.lax.broadcasted_iota(
            jnp.int32, hinge.shape, 0
        )
        hinge = jnp.where(row < batch, hinge, 0.0)

    # Lane-dense, full-vreg (8,128) store of this tile's partial sum.
    partial = jnp.sum(hinge)
    out_ref[...] = jnp.full(out_ref.shape, partial, dtype=jnp.float32)


def _choose_batch_tile(batch, feat, itemsize):
    """Pick a batch tile that keeps 3 inputs x 2 pipeline buffers well under
    the scoped-VMEM budget (conservative for v7x), multiple of 8 sublanes."""
    if batch <= 512:
        return batch  # single tile == full array dims, always legal
    vmem_budget = 24 * 1024 * 1024  # leave headroom under ~32 MiB scoped VMEM
    per_row_bytes = 3 * 2 * feat * itemsize
    tb = vmem_budget // max(per_row_bytes, 1)
    tb = max(8, min(512, (tb // 8) * 8))
    return min(tb, batch)


def triplet_loss(anchor, positive, negative, margin=1.0):
    """Pallas implementation of TripletLoss.forward. Returns a scalar (f32)."""
    assert anchor.shape == positive.shape == negative.shape
    assert anchor.ndim == 2, "expected (batch, feature) embeddings"
    B, D = anchor.shape

    tb = _choose_batch_tile(B, D, jnp.dtype(anchor.dtype).itemsize)
    num_tiles = pl.cdiv(B, tb)

    kernel = functools.partial(
        _triplet_loss_kernel, margin=float(margin), batch=B, tb=tb
    )

    # TODO(synk): for very wide embeddings (D >> 8K) add a second "arbitrary"
    # reduction grid axis over D with a (tb, 1) VMEM accumulator.
    partials = pl.pallas_call(
        kernel,
        out_shape=jax.ShapeDtypeStruct((num_tiles, 8, 128), jnp.float32),
        grid=(num_tiles,),
        in_specs=[
            pl.BlockSpec((tb, D), lambda i: (i, 0)),
            pl.BlockSpec((tb, D), lambda i: (i, 0)),
            pl.BlockSpec((tb, D), lambda i: (i, 0)),
        ],
        out_specs=pl.BlockSpec((1, 8, 128), lambda i: (i, 0, 0)),
        compiler_params=pltpu.CompilerParams(
            dimension_semantics=("parallel",)
        ),
    )(anchor, positive, negative)

    # Tiny final reduction over per-tile partial sums, then batch mean.
    return jnp.sum(partials[:, 0, 0]) / B


def _reference_triplet_loss(anchor, positive, negative, margin=1.0):
    # Pure-JAX reference mirroring the PyTorch semantics.
    a = anchor.astype(jnp.float32)
    p = positive.astype(jnp.float32)
    n = negative.astype(jnp.float32)
    pos = jnp.sqrt(jnp.sum((a - p + _EPS) ** 2, axis=-1))
    neg = jnp.sqrt(jnp.sum((a - n + _EPS) ** 2, axis=-1))
    return jnp.mean(jnp.maximum(pos - neg + margin, 0.0))


if __name__ == "__main__":
    key = jax.random.PRNGKey(0)
    k_a, k_p, k_n = jax.random.split(key, 3)

    B, D = 8, 32  # small embedding batch, consistent with the module
    anchor = jax.random.normal(k_a, (B, D), dtype=jnp.float32)
    positive = anchor + 0.1 * jax.random.normal(k_p, (B, D), dtype=jnp.float32)
    negative = jax.random.normal(k_n, (B, D), dtype=jnp.float32)

    loss = triplet_loss(anchor, positive, negative, margin=1.0)
    jax.block_until_ready(loss)

    ref = _reference_triplet_loss(anchor, positive, negative, margin=1.0)
    assert jnp.allclose(loss, ref, atol=1e-5, rtol=1e-5), (loss, ref)

    # Also exercise the tiled + ragged-last-tile path (B > tile, B % 8 != 0).
    B2, D2 = 1030, 256
    k_a2, k_p2, k_n2 = jax.random.split(jax.random.PRNGKey(1), 3)
    a2 = jax.random.normal(k_a2, (B2, D2), dtype=jnp.float32)
    p2 = a2 + 0.1 * jax.random.normal(k_p2, (B2, D2), dtype=jnp.float32)
    n2 = jax.random.normal(k_n2, (B2, D2), dtype=jnp.float32)
    loss2 = triplet_loss(a2, p2, n2, margin=1.0)
    jax.block_until_ready(loss2)
    ref2 = _reference_triplet_loss(a2, p2, n2, margin=1.0)
    assert jnp.allclose(loss2, ref2, atol=1e-5, rtol=1e-5), (loss2, ref2)

    print("KERNEL_OK")
</pallas_src>

<mosaic_0001>
module attributes {stable_mosaic.version = 11 : i64} {
  func.func @_triplet_loss_kernel(%arg0: i32, %arg1: memref<8x32xf32, #tpu.memory_space<vmem>>, %arg2: memref<8x32xf32, #tpu.memory_space<vmem>>, %arg3: memref<8x32xf32, #tpu.memory_space<vmem>>, %arg4: memref<1x8x128xf32, #tpu.memory_space<vmem>>) attributes {dimension_semantics = [#tpu.dimension_semantics<parallel>], iteration_bounds = array<i64: 1>, scalar_prefetch = 0 : i64, scratch_operands = 0 : i64, tpu.core_type = #tpu.core_type<tc>, window_params = [{transform_indices = @transform_0, window_bounds = array<i64: 8, 32>}, {transform_indices = @transform_1, window_bounds = array<i64: 8, 32>}, {transform_indices = @transform_2, window_bounds = array<i64: 8, 32>}, {transform_indices = @transform_3, window_bounds = array<i64: 1, 8, 128>}]} {
    %c0 = arith.constant 0 : index
    %c0_0 = arith.constant 0 : index
    %0 = vector.load %arg1[%c0, %c0_0] : memref<8x32xf32, #tpu.memory_space<vmem>>, vector<8x32xf32>
    %c0_1 = arith.constant 0 : index
    %c0_2 = arith.constant 0 : index
    %1 = vector.load %arg2[%c0_1, %c0_2] : memref<8x32xf32, #tpu.memory_space<vmem>>, vector<8x32xf32>
    %c0_3 = arith.constant 0 : index
    %c0_4 = arith.constant 0 : index
    %2 = vector.load %arg3[%c0_3, %c0_4] : memref<8x32xf32, #tpu.memory_space<vmem>>, vector<8x32xf32>
    %3 = arith.subf %0, %1 : vector<8x32xf32>
    %cst = arith.constant 9.99999997E-7 : f32
    %4 = vector.broadcast %cst : f32 to vector<8x32xf32>
    %5 = arith.addf %3, %4 : vector<8x32xf32>
    %6 = arith.subf %0, %2 : vector<8x32xf32>
    %cst_5 = arith.constant 9.99999997E-7 : f32
    %7 = vector.broadcast %cst_5 : f32 to vector<8x32xf32>
    %8 = arith.addf %6, %7 : vector<8x32xf32>
    %9 = arith.mulf %5, %5 : vector<8x32xf32>
    %cst_6 = arith.constant dense<0.000000e+00> : vector<8xf32>
    %10 = vector.multi_reduction <add>, %9, %cst_6 [1] : vector<8x32xf32> to vector<8xf32>
    %11 = vector.shape_cast %10 : vector<8xf32> to vector<8x1xf32>
    %12 = math.sqrt %11 : vector<8x1xf32>
    %13 = arith.mulf %8, %8 : vector<8x32xf32>
    %cst_7 = arith.constant dense<0.000000e+00> : vector<8xf32>
    %14 = vector.multi_reduction <add>, %13, %cst_7 [1] : vector<8x32xf32> to vector<8xf32>
    %15 = vector.shape_cast %14 : vector<8xf32> to vector<8x1xf32>
    %16 = math.sqrt %15 : vector<8x1xf32>
    %17 = arith.subf %12, %16 : vector<8x1xf32>
    %cst_8 = arith.constant 1.000000e+00 : f32
    %18 = vector.broadcast %cst_8 : f32 to vector<8x1xf32>
    %19 = arith.addf %17, %18 : vector<8x1xf32>
    %cst_9 = arith.constant 0.000000e+00 : f32
    %20 = vector.broadcast %cst_9 : f32 to vector<8x1xf32>
    %21 = arith.maximumf %19, %20 : vector<8x1xf32>
    %22 = vector.shape_cast %21 : vector<8x1xf32> to vector<1x8x1xf32>
    %cst_10 = arith.constant dense<0.000000e+00> : vector<1xf32>
    %23 = vector.multi_reduction <add>, %22, %cst_10 [1, 2] : vector<1x8x1xf32> to vector<1xf32>
    %24 = vector.shape_cast %23 : vector<1xf32> to vector<1x1x1xf32>
    %25 = vector.extract %24[0, 0, 0] : f32 from vector<1x1x1xf32>
    %26 = vector.broadcast %25 : f32 to vector<1x8x128xf32>
    %c0_11 = arith.constant 0 : index
    %c0_12 = arith.constant 0 : index
    %c0_13 = arith.constant 0 : index
    %27 = vector.load %arg4[%c0_11, %c0_12, %c0_13] : memref<1x8x128xf32, #tpu.memory_space<vmem>>, vector<1x8x128xf32>
    tpu.vector_store %arg4[%c0_11, %c0_12, %c0_13], %26 {strides = array<i32>} : memref<1x8x128xf32, #tpu.memory_space<vmem>>, vector<1x8x128xf32>,
    return
  }
  func.func @transform_0(%arg0: i32) -> (i32, i32) {
    %c0_i32 = arith.constant 0 : i32
    %c0_i32_0 = arith.constant 0 : i32
    return %arg0, %c0_i32 : i32, i32
  }
  func.func @transform_1(%arg0: i32) -> (i32, i32) {
    %c0_i32 = arith.constant 0 : i32
    %c0_i32_0 = arith.constant 0 : i32
    return %arg0, %c0_i32 : i32, i32
  }
  func.func @transform_2(%arg0: i32) -> (i32, i32) {
    %c0_i32 = arith.constant 0 : i32
    %c0_i32_0 = arith.constant 0 : i32
    return %arg0, %c0_i32 : i32, i32
  }
  func.func @transform_3(%arg0: i32) -> (i32, i32, i32) {
    %c0_i32 = arith.constant 0 : i32
    %c0_i32_0 = arith.constant 0 : i32
    %c0_i32_1 = arith.constant 0 : i32
    return %arg0, %c0_i32, %c0_i32_0 : i32, i32, i32
  }
}

</mosaic_0001>

<bundles_post_ra>
// kernel: tpu_custom_call.1
= control target key start
LH: loop header
LB: loop body
LE: loop exit
PB: predicated region body
PF: predicated region fallthrough
CT: control target
= control target key end

     0   :  { %8 = vsyncpa [#allocation3], 0  ;;  %s244_s0 = inlined_call_operand.hbm [shape: f32[8,32], index: 0, kind: input, shape index: {}]   ;;  %s245_s1 = inlined_call_operand.hbm [shape: f32[8,32], index: 1, kind: input, shape index: {}]   ;;  %s246_s2 = inlined_call_operand.hbm [shape: f32[8,32], index: 2, kind: input, shape index: {}]   ;;  %s247_s3 = inlined_call_operand.hbm [shape: f32[1,8,128], index: 3, kind: output, shape index: {}]  }
   0x1   :  { %9 = vsyncpa [#allocation6], 0 }
   0x2   :  { %10 = vsyncpa [#allocation4], 0  ;;  %s208_s12 = smov [#allocation5]   ;;  %s209_s14 = smov [#allocation2]  }
   0x3   :  { %s27_s13 = sshll.u32 %s208_s12, 4  ;;  %s17_s15 = sshll.u32 %s209_s14, 4  ;;  %s28_s13 = int_to_ptr.vmem [resolvable:$true] %s27_s13  ;;  %s18_s15 = int_to_ptr.vmem [resolvable:$true] %s17_s15 }
   0x4   :  { %s130_s16 = scalar_lea.vmem %s28_s13, 128  ;;  %p135_p1 = scmp.lt.s32.totalorder %s28_s13, %s28_s13 }
   0x5   :  { %p131_p0 = scmp.ne.s32.totalorder %s28_s13, %s130_s16  ;;  %p136_p2 = scmp.lt.s32.totalorder %s130_s16, %s130_s16 }
   0x7   :  { %p137_p3 = por %p136_p2, %p135_p1 }
   0x9   :  { %p138_p4 = pnand %p137_p3, %p131_p0 }
   0xb   :  { %141 = shalt.err (!%p138_p4)
}
   0xc   :  { %30 = dma.hbm_to_vmem [thread:$0]  %s245_s1, 128, %s28_s13, [#allocation6]  }
   0xd   :  { %s150_s19 = scalar_lea.vmem %s18_s15, 128  ;;  %p155_p6 = scmp.lt.s32.totalorder %s18_s15, %s18_s15 }
   0xe   :  { %p151_p5 = scmp.ne.s32.totalorder %s18_s15, %s150_s19  ;;  %p156_p7 = scmp.lt.s32.totalorder %s150_s19, %s150_s19 }
  0x10   :  { %p157_p8 = por %p156_p7, %p155_p6 }
  0x12   :  { %p158_p9 = pnand %p157_p8, %p151_p5 }
  0x14   :  { %161 = shalt.err (!%p158_p9)
}
  0x15   :  { %20 = dma.hbm_to_vmem [thread:$0]  %s244_s0, 128, %s18_s15, [#allocation3]  }
  0x16   :  { %s210_s22 = smov [#allocation7]  }
  0x17   :  { %s37_s23 = sshll.u32 %s210_s22, 4  ;;  %s38_s23 = int_to_ptr.vmem [resolvable:$true] %s37_s23 }
  0x18   :  { %s170_s24 = scalar_lea.vmem %s38_s23, 128  ;;  %p175_p11 = scmp.lt.s32.totalorder %s38_s23, %s38_s23 }
  0x19   :  { %p171_p10 = scmp.ne.s32.totalorder %s38_s23, %s170_s24  ;;  %p176_p12 = scmp.lt.s32.totalorder %s170_s24, %s170_s24 }
  0x1b   :  { %p177_p13 = por %p176_p12, %p175_p11 }
  0x1d   :  { %p178_p0 = pnand %p177_p13, %p171_p10 }
  0x1f   :  { %181 = shalt.err (!%p178_p0)
}
  0x20   :  { %40 = dma.hbm_to_vmem [thread:$0]  %s246_s2, 128, %s38_s23, [#allocation6]  }
  0x21   :  { %202 = dma.done.wait [#allocation3], 128  }
  0x22   :  { %203 = vsyncadd [#allocation3], 4294967168 }
  0x23   :  { %204 = dma.done.wait [#allocation6], 256  }
  0x24   :  { %205 = vsyncadd [#allocation6], 4294967040  ;;  %v50_v0 = vld [vmem:[#allocation2] sm:$0xff]  ;;  %v51_v1 = vld [vmem:[#allocation5] sm:$0xff]  ;;  %vm58_vm0 = vcmask 261120   ;;  %vm83_vm5 = vcmask 7168  }
  0x25   :  { %v52_v2 = vld [vmem:[#allocation7] sm:$0xff]  ;;  %v53_v3 = vsub.f32 %v50_v0, %v51_v1  ;;  %s211_s0 = smov [#allocation8]  }
  0x26   :  { %v55_v4 = vsub.f32 %v50_v0, %v52_v2  ;;  %s102_s2 = sshll.u32 %s211_s0, 4  ;;  %s103_s2 = int_to_ptr.vmem [resolvable:$true] %s102_s2 }
  0x27   :  { %v54_v5 = vadd.f32 1e-06, %v53_v3  ;;  %s182_s27 = scalar_lea.vmem %s103_s2, 128  ;;  %p187_p2 = scmp.lt.s32.totalorder %s103_s2, %s103_s2 }
  0x28   :  { %v56_v6 = vadd.f32 1e-06, %v55_v4  ;;  %p183_p1 = scmp.ne.s32.totalorder %s103_s2, %s182_s27  ;;  %p188_p3 = scmp.lt.s32.totalorder %s182_s27, %s182_s27 }
  0x29   :  { %v57_v7 = vmul.f32 %v54_v5, %v54_v5 }
  0x2a   :  { %v69_v8 = vmul.f32 %v56_v6, %v56_v6  ;;  %p189_p4 = por %p188_p3, %p187_p2 }
  0x2b   :  { %v59_v9 = vsel %vm58_vm0, %v57_v7, 0.0 }
  0x2c   :  { %60 = vadd.xlane.f32.xlu0 %v59_v9  ;;  %v70_v10 = vsel %vm58_vm0, %v69_v8, 0.0  ;;  %p190_p5 = pnand %p189_p4, %p183_p1 }
  0x30   :  { %71 = vadd.xlane.f32.xlu0 %v70_v10 }
  0xb5   :  { %v61_v11 = vpop.xlane.xlu0 %60 }
  0xb6   :  { %118 = vrsqrt.f32 %v61_v11  ;;  %vm64_vm1 = vcmp.eq.f32.partialorder %v61_v11, inf  ;;  %v67_v18 = vand.u32 2147483648, %v61_v11  ;;  %vm66_vm3 = vcmp.eq.f32.partialorder %v61_v11, 0.0 }
  0xb9   :  { %v72_v12 = vpop.xlane.xlu0 %71 }
  0xba   :  { %120 = vrsqrt.f32 %v72_v12  ;;  %vm75_vm2 = vcmp.eq.f32.partialorder %v72_v12, inf  ;;  %v78_v19 = vand.u32 2147483648, %v72_v12  ;;  %vm77_vm4 = vcmp.eq.f32.partialorder %v72_v12, 0.0 }
  0xc3   :  { %v119_v13 = vpop.eup %118 }
  0xc4   :  { %v63_v14 = vmul.f32 %v119_v13, %v61_v11 }
  0xc6   :  { %v65_v17 = vsel %vm64_vm1, %v61_v11, %v63_v14 }
  0xc7   :  { %v121_v15 = vpop.eup %120  ;;  %v68_v21 = vsel %vm66_vm3, %v67_v18, %v65_v17 }
  0xc8   :  { %v74_v16 = vmul.f32 %v121_v15, %v72_v12 }
  0xca   :  { %v76_v20 = vsel %vm75_vm2, %v72_v12, %v74_v16 }
  0xcb   :  { %v79_v22 = vsel %vm77_vm4, %v78_v19, %v76_v20 }
  0xcc   :  { %v80_v23 = vsub.f32 %v68_v21, %v79_v22 }
  0xce   :  { %v81_v24 = vadd.f32 1.0, %v80_v23 }
  0xd0   :  { %v82_v25 = vmax.f32 %v81_v24, 0.0 }
  0xd2   :  { %v84_v26 = vsel %vm83_vm5, %v82_v25, 0.0 }
  0xd3   :  { %85 = vadd.xlane.f32.xlu1 %v84_v26 }
 0x15c   :  { %v86_v27 = vpop.xlane.xlu1 %85 }
 0x15d   :  { %v87_v28 = vrot.slane %v86_v27, 4 }
 0x15f   :  { %v88_v29 = vadd.f32 %v87_v28, %v86_v27 }
 0x161   :  { %v89_v30 = vrot.slane %v88_v29, 2 }
 0x163   :  { %v90_v31 = vadd.f32 %v89_v30, %v88_v29 }
 0x165   :  { %v91_v32 = vrot.slane %v90_v31, 1 }
 0x167   :  { %v92_v33 = vadd.f32 %v91_v32, %v90_v31 }
 0x169   :  { %112 = vpush %v92_v33 }
 0x19a   :  { %s113_s26 = spop %112 }
 0x19b   :  { %v94_v34 = vstv %s113_s26 }
 0x19c   :  { %95 = vst [vmem:[#allocation8] sm:$0xff] %v94_v34 }
 0x19d   :  { %193 = shalt.err (!%p190_p5)
}
 0x19e   :  { %105 = dma.vmem_to_hbm [thread:$0]  %s103_s2, 128, %s247_s3, [#allocation4]  }
 0x19f   :  { %206 = dma.done.wait [#allocation4], 128  }
 0x1a0   :  { %207 = vsyncadd [#allocation4], 4294967168 }
 0x1a1   :  { %109 = vsyncpa [#allocation3], 1 }
 0x1a2   :  { %110 = vsyncpa [#allocation6], 1 }
 0x1a3   :  { %111 = vsyncpa [#allocation4], 1 }

</bundles_post_ra>
